<compile_context>
chip_gen: v7x
topology: tpu7x:2x2x1
jax: 0.10.0
libtpu: 0.0.40
codegen_flags: <defaults>
</compile_context>

<pallas_src>
import functools

import numpy as np
import jax
import jax.numpy as jnp
from jax.experimental import pallas as pl
from jax.experimental.pallas import tpu as pltpu


# ----------------------------------------------------------------------------
# helpers (mirrors the PyTorch _cal_conv_padding exactly)
# ----------------------------------------------------------------------------
def _cal_conv_padding(input_len, output_len, kernel_size, n_strides, dilation_rate):
    padding_diff = (output_len - 1) * n_strides + (dilation_rate * (kernel_size - 1) + 1) - input_len
    padding = int(np.ceil(padding_diff / 2))
    output_padding = 2 * padding - padding_diff
    return padding, output_padding


def _erf(z):
    # Abramowitz & Stegun 7.1.26 rational approximation, |abs err| < 1.5e-7.
    sgn = jnp.where(z >= 0.0, 1.0, -1.0)
    az = jnp.abs(z)
    t = 1.0 / (1.0 + 0.3275911 * az)
    poly = t * (0.254829592 + t * (-0.284496736 + t * (1.421413741
              + t * (-1.453152027 + t * 1.061405429))))
    return sgn * (1.0 - poly * jnp.exp(-az * az))


def _gelu_exact(x):
    # TODO(synk): exact GELU needs erf; lax.erf has no guaranteed Mosaic lowering,
    # so we use a <1.5e-7 erf approximation built from supported ops (exp).
    return 0.5 * x * (1.0 + _erf(x * 0.7071067811865476))


_TILE_ROWS = 512  # 512 rows x (few hundred) f32 lanes << 32 MiB scoped VMEM on all chips


def _round_up(n, m):
    return ((n + m - 1) // m) * m


def _row_tiling(n):
    """Return (padded_rows, tile_rows) with padded_rows % tile_rows == 0."""
    if n <= _TILE_ROWS:
        n_pad = _round_up(max(n, 8), 8)
        return n_pad, n_pad
    n_pad = _round_up(n, _TILE_ROWS)
    return n_pad, _TILE_ROWS


def _pad_rows(x2d, n_pad):
    n = x2d.shape[0]
    return x2d if n == n_pad else jnp.pad(x2d, ((0, n_pad - n), (0, 0)))


# ----------------------------------------------------------------------------
# Pallas kernels
# ----------------------------------------------------------------------------
def _deconv_kernel(x_ref, w_ref, b_ref, o_ref):
    # x_ref: (TILE, n_win*C_in)  polyphase input windows (no inserted zeros)
    # w_ref: (n_win*C_in, S*C_out) fused sub-pixel weight, VMEM-resident
    # b_ref: (1, S*C_out)
    acc = jnp.dot(x_ref[...].astype(w_ref.dtype), w_ref[...],
                  preferred_element_type=jnp.float32)
    o_ref[...] = (acc + b_ref[...].astype(jnp.float32)).astype(o_ref.dtype)


def _fused_mlp_kernel(*refs, n_hidden):
    # refs = (x_ref, [w, b, gamma, beta] * n_hidden, w_out, b_out, o_ref)
    x_ref, o_ref = refs[0], refs[-1]
    h = x_ref[...].astype(jnp.float32)
    idx = 1
    for _ in range(n_hidden):
        w_ref, b_ref, g_ref, beta_ref = refs[idx:idx + 4]
        idx += 4
        a = jnp.dot(h.astype(w_ref.dtype), w_ref[...],
                    preferred_element_type=jnp.float32) + b_ref[...].astype(jnp.float32)
        a = _gelu_exact(a)
        mu = jnp.mean(a, axis=-1, keepdims=True)
        var = jnp.mean((a - mu) ** 2, axis=-1, keepdims=True)
        h = (a - mu) * jax.lax.rsqrt(var + 1e-5)
        h = h * g_ref[...].astype(jnp.float32) + beta_ref[...].astype(jnp.float32)
    w_out_ref, b_out_ref = refs[idx], refs[idx + 1]
    o_ref[...] = (jnp.dot(h.astype(w_out_ref.dtype), w_out_ref[...],
                          preferred_element_type=jnp.float32)
                  + b_out_ref[...].astype(jnp.float32)).astype(o_ref.dtype)


# ----------------------------------------------------------------------------
# wrappers
# ----------------------------------------------------------------------------
def conv_transpose1d(x, w, b, *, stride, padding, output_padding):
    """ConvTranspose1d (channels-last activations) via sub-pixel matmul.

    x: (B, L_in, C_in); w: (C_in, C_out, K) [PyTorch layout]; b: (C_out,)
    Returns (B, L_out, C_out).  Relies on L_out == stride * L_in, which the
    module's _cal_conv_padding guarantees.
    """
    B, L_in, C_in = x.shape
    _, C_out, K = w.shape
    s, p = stride, padding
    L_out = (L_in - 1) * s - 2 * p + (K - 1) + output_padding + 1
    assert L_out == s * L_in, "padding config must give L_out == stride*L_in"

    # window offsets d such that tap k = r + p - d*s is valid for some phase r
    d_min = -((K - 1 - p) // s)          # == ceil((p - K + 1) / s)
    d_max = (s - 1 + p) // s
    n_win = d_max - d_min + 1

    # fused sub-pixel weight (n_win*C_in, s*C_out); zeros only live here
    blocks = []
    for d in range(d_min, d_max + 1):
        row = []
        for r in range(s):
            k = r + p - d * s
            row.append(w[:, :, k] if 0 <= k < K
                       else jnp.zeros((C_in, C_out), w.dtype))
        blocks.append(jnp.concatenate(row, axis=1))
    w_eff = jnp.concatenate(blocks, axis=0)                 # (n_win*C_in, s*C_out)
    b_eff = jnp.tile(b, (s,)).reshape(1, s * C_out)

    # polyphase input windows (pure layout glue; no zero insertion)
    lpad, rpad = max(0, -d_min), max(0, d_max)
    x_ext = jnp.pad(x, ((0, 0), (lpad, rpad), (0, 0)))
    views = [x_ext[:, d + lpad:d + lpad + L_in, :] for d in range(d_min, d_max + 1)]
    x_win = jnp.concatenate(views, axis=-1).reshape(B * L_in, n_win * C_in)

    N = B * L_in
    n_pad, tile = _row_tiling(N)
    x_win = _pad_rows(x_win, n_pad)

    c_in_eff = n_win * C_in
    c_out_eff = s * C_out
    cost = pl.CostEstimate(
        flops=2 * n_pad * c_in_eff * c_out_eff,
        transcendentals=0,
        bytes_accessed=4 * (n_pad * c_in_eff + c_in_eff * c_out_eff + n_pad * c_out_eff),
    )
    y = pl.pallas_call(
        _deconv_kernel,
        out_shape=jax.ShapeDtypeStruct((n_pad, c_out_eff), x.dtype),
        grid=(n_pad // tile,),
        in_specs=[
            pl.BlockSpec((tile, c_in_eff), lambda i: (i, 0)),
            pl.BlockSpec((c_in_eff, c_out_eff), lambda i: (0, 0)),
            pl.BlockSpec((1, c_out_eff), lambda i: (0, 0)),
        ],
        out_specs=pl.BlockSpec((tile, c_out_eff), lambda i: (i, 0)),
        compiler_params=pltpu.CompilerParams(dimension_semantics=("parallel",)),
        cost_estimate=cost,
    )(x_win, w_eff, b_eff)

    return y[:N].reshape(B, L_in, s, C_out).reshape(B, L_out, C_out)


def fused_mlp(x2d, hidden_layers, out_w, out_b):
    """Fused [Linear->GELU->LayerNorm]*H -> Linear over rows of x2d."""
    N, c_in = x2d.shape
    d_out = out_w.shape[1]
    n_hidden = len(hidden_layers)
    n_pad, tile = _row_tiling(N)
    xp = _pad_rows(x2d, n_pad)

    inputs = [xp]
    in_specs = [pl.BlockSpec((tile, c_in), lambda i: (i, 0))]
    flops, trans = 0, 0
    bytes_acc = 4 * (n_pad * c_in + n_pad * d_out)
    d_prev = c_in
    for layer in hidden_layers:
        w, b, g, be = layer["w"], layer["b"], layer["gamma"], layer["beta"]
        h = w.shape[1]
        inputs += [w, b.reshape(1, h), g.reshape(1, h), be.reshape(1, h)]
        in_specs += [pl.BlockSpec((d_prev, h), lambda i: (0, 0)),
                     pl.BlockSpec((1, h), lambda i: (0, 0)),
                     pl.BlockSpec((1, h), lambda i: (0, 0)),
                     pl.BlockSpec((1, h), lambda i: (0, 0))]
        flops += 2 * n_pad * d_prev * h
        trans += n_pad * h                      # exp in the erf of GELU
        bytes_acc += 4 * (d_prev * h + 3 * h)
        d_prev = h
    inputs += [out_w, out_b.reshape(1, d_out)]
    in_specs += [pl.BlockSpec((d_prev, d_out), lambda i: (0, 0)),
                 pl.BlockSpec((1, d_out), lambda i: (0, 0))]
    flops += 2 * n_pad * d_prev * d_out
    bytes_acc += 4 * (d_prev * d_out + d_out)

    kernel = functools.partial(_fused_mlp_kernel, n_hidden=n_hidden)
    y = pl.pallas_call(
        kernel,
        out_shape=jax.ShapeDtypeStruct((n_pad, d_out), x2d.dtype),
        grid=(n_pad // tile,),
        in_specs=in_specs,
        out_specs=pl.BlockSpec((tile, d_out), lambda i: (i, 0)),
        compiler_params=pltpu.CompilerParams(dimension_semantics=("parallel",)),
        cost_estimate=pl.CostEstimate(flops=flops, transcendentals=trans,
                                      bytes_accessed=bytes_acc),
    )(*inputs)
    return y[:N]


# ----------------------------------------------------------------------------
# parameter construction (deterministic, synthetic)
# ----------------------------------------------------------------------------
def init_params(key, *, d_model, emb_len, n_filters, kernel_sizes, n_strides,
                d_hidden, n_channels):
    params = {"deconv": [], "hidden": [], "out": None}

    seq_len = emb_len
    c_in = d_model
    for i in range(len(n_filters)):
        seq_len = seq_len * n_strides[i]
        c_out, k, s = n_filters[i], kernel_sizes[i], n_strides[i]
        pad, opad = _cal_conv_padding(input_len=seq_len * s, output_len=seq_len,
                                      kernel_size=k, n_strides=s, dilation_rate=1)
        key, k1, k2 = jax.random.split(key, 3)
        w = 0.02 * jax.random.normal(k1, (c_in, c_out, k), jnp.float32)  # PyTorch ConvT layout
        b = 0.02 * jax.random.normal(k2, (c_out,), jnp.float32)
        params["deconv"].append(dict(w=w, b=b, stride=s, padding=pad, output_padding=opad))
        c_in = c_out

    d_in = n_filters[-1]
    for h in d_hidden:
        key, k1 = jax.random.split(key)
        w = 0.02 * jax.random.truncated_normal(k1, -2.0, 2.0, (d_in, h), jnp.float32)
        params["hidden"].append(dict(w=w,
                                     b=jnp.zeros((h,), jnp.float32),
                                     gamma=jnp.ones((h,), jnp.float32),
                                     beta=jnp.zeros((h,), jnp.float32)))
        d_in = h

    key, k1 = jax.random.split(key)
    w = 0.02 * jax.random.truncated_normal(k1, -2.0, 2.0, (d_in, n_channels), jnp.float32)
    params["out"] = dict(w=w, b=jnp.zeros((n_channels,), jnp.float32))
    return params


def time_rgs_head_forward(emb, params):
    """emb: (B, emb_len, d_model) -> (B, seq_len, n_channels)"""
    x = emb
    for layer in params["deconv"]:
        x = conv_transpose1d(x, layer["w"], layer["b"],
                             stride=layer["stride"],
                             padding=layer["padding"],
                             output_padding=layer["output_padding"])
    B, L, C = x.shape
    y2 = fused_mlp(x.reshape(B * L, C), params["hidden"],
                   params["out"]["w"], params["out"]["b"])
    return y2.reshape(B, L, -1)


# ----------------------------------------------------------------------------
# pure-JAX reference (for correctness check)
# ----------------------------------------------------------------------------
def _reference_forward(emb, params):
    hi = jax.lax.Precision.HIGHEST
    x = emb
    for layer in params["deconv"]:
        s, p, op = layer["stride"], layer["padding"], layer["output_padding"]
        w, b = layer["w"], layer["b"]
        B, L_in, C_in = x.shape
        _, C_out, K = w.shape
        L_out = (L_in - 1) * s - 2 * p + (K - 1) + op + 1
        full = jnp.zeros((B, (L_in - 1) * s + K + p + op, C_out), jnp.float32)
        for k in range(K):
            contrib = jnp.einsum("blc,cd->bld", x, w[:, :, k], precision=hi)
            full = full.at[:, k:k + (L_in - 1) * s + 1:s, :].add(contrib)
        x = full[:, p:p + L_out, :] + b
    h = x
    for layer in params["hidden"]:
        a = jnp.einsum("blc,cd->bld", h, layer["w"], precision=hi) + layer["b"]
        a = jax.nn.gelu(a, approximate=False)
        mu = a.mean(-1, keepdims=True)
        var = ((a - mu) ** 2).mean(-1, keepdims=True)
        h = (a - mu) * jax.lax.rsqrt(var + 1e-5) * layer["gamma"] + layer["beta"]
    return jnp.einsum("blc,cd->bld", h, params["out"]["w"], precision=hi) + params["out"]["b"]


# ----------------------------------------------------------------------------
if __name__ == "__main__":
    # small shapes consistent with the module's forward
    B, emb_len, d_model = 2, 8, 32
    n_filters = [16, 8]
    kernel_sizes = [3, 3]
    n_strides = [2, 2]
    d_hidden = [32]
    n_channels = 4

    key = jax.random.PRNGKey(0)
    key, kx = jax.random.split(key)
    emb = jax.random.normal(kx, (B, emb_len, d_model), jnp.float32)

    params = init_params(key, d_model=d_model, emb_len=emb_len,
                         n_filters=n_filters, kernel_sizes=kernel_sizes,
                         n_strides=n_strides, d_hidden=d_hidden,
                         n_channels=n_channels)

    out = time_rgs_head_forward(emb, params)
    out = jax.block_until_ready(out)

    expected_len = emb_len * int(np.prod(n_strides))
    assert out.shape == (B, expected_len, n_channels), out.shape
    assert bool(jnp.all(jnp.isfinite(out)))

    ref = jax.block_until_ready(_reference_forward(emb, params))
    assert bool(jnp.allclose(out, ref, atol=2e-3, rtol=2e-3)), (
        float(jnp.max(jnp.abs(out - ref))))

    print("KERNEL_OK")
</pallas_src>

<mosaic_0001>
module attributes {stable_mosaic.version = 11 : i64} {
  func.func @_deconv_kernel(%arg0: i32, %arg1: memref<16x64xf32, #tpu.memory_space<vmem>>, %arg2: memref<64x32xf32, #tpu.memory_space<vmem>>, %arg3: memref<1x32xf32, #tpu.memory_space<vmem>>, %arg4: memref<16x32xf32, #tpu.memory_space<vmem>>) attributes {dimension_semantics = [#tpu.dimension_semantics<parallel>], iteration_bounds = array<i64: 1>, scalar_prefetch = 0 : i64, scratch_operands = 0 : i64, tpu.core_type = #tpu.core_type<tc>, window_params = [{transform_indices = @transform_0, window_bounds = array<i64: 16, 64>}, {pipeline_mode = #tpu.pipeline_mode<synchronous>, transform_indices = @transform_1, window_bounds = array<i64: 64, 32>}, {pipeline_mode = #tpu.pipeline_mode<synchronous>, transform_indices = @transform_2, window_bounds = array<i64: 1, 32>}, {transform_indices = @transform_3, window_bounds = array<i64: 16, 32>}]} {
    %c0 = arith.constant 0 : index
    %c0_0 = arith.constant 0 : index
    %0 = vector.load %arg1[%c0, %c0_0] : memref<16x64xf32, #tpu.memory_space<vmem>>, vector<16x64xf32>
    %c0_1 = arith.constant 0 : index
    %c0_2 = arith.constant 0 : index
    %1 = vector.load %arg2[%c0_1, %c0_2] : memref<64x32xf32, #tpu.memory_space<vmem>>, vector<64x32xf32>
    %cst = arith.constant dense<0.000000e+00> : vector<16x32xf32>
    %2 = tpu.matmul %0, %1, %cst {dimension_numbers = #tpu.dot_dimension_numbers<[1], [0], [0], [1], [0, 0, 1, 1], [], []>} : vector<16x64xf32>, vector<64x32xf32>, vector<16x32xf32> -> vector<16x32xf32>
    %c0_3 = arith.constant 0 : index
    %c0_4 = arith.constant 0 : index
    %3 = vector.load %arg3[%c0_3, %c0_4] : memref<1x32xf32, #tpu.memory_space<vmem>>, vector<1x32xf32>
    %4 = vector.broadcast %3 : vector<1x32xf32> to vector<16x32xf32>
    %5 = arith.addf %2, %4 : vector<16x32xf32>
    %c0_5 = arith.constant 0 : index
    %c0_6 = arith.constant 0 : index
    %6 = vector.load %arg4[%c0_5, %c0_6] : memref<16x32xf32, #tpu.memory_space<vmem>>, vector<16x32xf32>
    tpu.vector_store %arg4[%c0_5, %c0_6], %5 {strides = array<i32>} : memref<16x32xf32, #tpu.memory_space<vmem>>, vector<16x32xf32>,
    return
  }
  func.func @transform_0(%arg0: i32) -> (i32, i32) {
    %c0_i32 = arith.constant 0 : i32
    %c0_i32_0 = arith.constant 0 : i32
    return %arg0, %c0_i32 : i32, i32
  }
  func.func @transform_1(%arg0: i32) -> (i32, i32) {
    %c0_i32 = arith.constant 0 : i32
    %c0_i32_0 = arith.constant 0 : i32
    %c0_i32_1 = arith.constant 0 : i32
    return %c0_i32, %c0_i32_0 : i32, i32
  }
  func.func @transform_2(%arg0: i32) -> (i32, i32) {
    %c0_i32 = arith.constant 0 : i32
    %c0_i32_0 = arith.constant 0 : i32
    %c0_i32_1 = arith.constant 0 : i32
    return %c0_i32, %c0_i32_0 : i32, i32
  }
  func.func @transform_3(%arg0: i32) -> (i32, i32) {
    %c0_i32 = arith.constant 0 : i32
    %c0_i32_0 = arith.constant 0 : i32
    return %arg0, %c0_i32 : i32, i32
  }
}

</mosaic_0001>

<bundles_post_ra>
// kernel: tpu_custom_call.1
= control target key start
LH: loop header
LB: loop body
LE: loop exit
PB: predicated region body
PF: predicated region fallthrough
CT: control target
= control target key end

     0   :  { %vm32_vm0 = vcmask 523264   ;;  %s278_s0 = inlined_call_operand.vmem [shape: f32[16,64], index: 0, kind: input, shape index: {}]   ;;  %s279_s1 = inlined_call_operand.vmem [shape: f32[64,32], index: 1, kind: input, shape index: {}]   ;;  %s280_s2 = inlined_call_operand.vmem [shape: f32[1,32], index: 2, kind: input, shape index: {}]   ;;  %s281_s3 = inlined_call_operand.hbm [shape: f32[16,32], index: 3, kind: output, shape index: {}]  }
   0x1   :  { %v17_v0 = vld [vmem:[%s279_s1] sm:$0xff]  ;;  %v18_v1 = vld [vmem:[%s279_s1 + $0x8] sm:$0xff]  ;;  %v19_v2 = vld [vmem:[%s279_s1 + $0x10] sm:$0xff] }
   0x2   :  { %v165_v3 = vpack.c.bf16 %v18_v1, %v17_v0  ;;  %v20_v4 = vld [vmem:[%s279_s1 + $0x18] sm:$0xff]  ;;  %v21_v6 = vld [vmem:[%s279_s1 + $0x20] sm:$0xff]  ;;  %v22_v7 = vld [vmem:[%s279_s1 + $0x28] sm:$0xff] }
   0x3   :  { %v169_v5 = vpack.c.bf16 %v20_v4, %v19_v2  ;;  %v15_v8 = vld [vmem:[%s278_s0] sm:$0xff] }
   0x4   :  { %166 = vmatprep.subr.bf16.mxu0 %v165_v3  ;;  %162 = vmatprep.mubr.msk.f32.mxu0 %vm32_vm0, %v15_v8 }
   0x5   :  { %8 = vsyncpa [#allocation3], 0  ;;  %168 = vmatpush3.bf16.msra.mxu0 %v165_v3  ;;  %v173_v9 = vpack.c.bf16 %v22_v7, %v21_v6  ;;  %v23_v10 = vld [vmem:[%s279_s1 + $0x30] sm:$0xff]  ;;  %v24_v11 = vld [vmem:[%s279_s1 + $0x38] sm:$0xff]  ;;  %s208_s7 = smov [#allocation2]   ;;  %vm114_vm1 = vcmask 261120  }
   0x6   :  { %170 = vmatprep.subr.bf16.mxu0 %v169_v5  ;;  %v177_v12 = vpack.c.bf16 %v24_v11, %v23_v10  ;;  %v16_v13 = vld [vmem:[%s278_s0 + $0x8] sm:$0xff]  ;;  %v133_v14 = vld [vmem:[%s280_s2] ss:$0 sm:$0xff]  ;;  %s122_s8 = sshll.u32 %s208_s7, 4  ;;  %s123_s8 = int_to_ptr.vmem [resolvable:$true] %s122_s8 }
   0x7   :  { %s184_s1 = scalar_lea.vmem %s123_s8, 256  ;;  %p189_p1 = scmp.lt.s32.totalorder %s123_s8, %s123_s8 }
   0x8   :  { %p185_p0 = scmp.ne.s32.totalorder %s123_s8, %s184_s1  ;;  %p190_p2 = scmp.lt.s32.totalorder %s184_s1, %s184_s1 }
   0x9   :  { %172 = vmatpush3.bf16.msra.mxu0 %v169_v5 }
   0xa   :  { %174 = vmatprep.subr.bf16.mxu0 %v173_v9  ;;  %p191_p3 = por %p190_p2, %p189_p1 }
   0xc   :  { %p192_p4 = pnand %p191_p3, %p185_p0 }
   0xd   :  { %176 = vmatpush3.bf16.msra.mxu0 %v173_v9 }
   0xe   :  { %178 = vmatprep.subr.bf16.mxu0 %v177_v12 }
  0x11   :  { %180 = vmatpush3.bf16.msra.mxu0 %v177_v12 }
  0x14   :  { %163 = vmatmul.mubr.msk.f32.vlgmr.msra.gmra.mrb[0].mxu0 %vm32_vm0, %v16_v13 }
  0xe7   :  { %v164_v15 = vpop.f32.mrb[0].mxu0 }
  0xe8   :  { %v111_v16 = vadd.f32 %v164_v15, %v133_v14  ;;  %v105_v17 = vpop.f32.mrb[1].mxu0 }
  0xe9   :  { %v106_v18 = vadd.f32 %v133_v14, %v105_v17 }
  0xea   :  { %116 = vst.msk [vmem:[#allocation2 + $0x8] sm:$0xff] %vm114_vm1, %v111_v16 }
  0xeb   :  { %115 = vst.msk [vmem:[#allocation2] sm:$0xff] %vm114_vm1, %v106_v18 }
  0xec   :  { %195 = shalt.err (!%p192_p4)
}
  0xed   :  { %s196_s2 = scalar_lea.hbm %s281_s3, 256 }
  0xee   :  { %p197_p5 = scmp.ne.s32.totalorder %s281_s3, %s196_s2  ;;  %p200_p6 = scmp.lt.u32.totalorder %s196_s2, %s281_s3 }
  0xf0   :  { %p202_p7 = pnand %p200_p6, %p197_p5 }
  0xf2   :  { %205 = shalt.err (!%p202_p7)
}
  0xf3   :  { %s209_s14 = smov 128   ;;  %s210_s15 = smov 8  }
  0xf4   :  { %128 = dma.vmem_to_hbm [thread:$0]  %s123_s8, 256, %s281_s3, [#allocation3], %s209_s14, %s209_s14, %s210_s15  }
  0xf5   :  { %206 = dma.done.wait [#allocation3], 256  }
  0xf6   :  { %207 = vsyncadd [#allocation3], 4294967040 }
  0xf7   :  { %132 = vsyncpa [#allocation3], 1 }

</bundles_post_ra>
